<compile_context>
chip_gen: v5e
topology: v5e:2x2
jax: 0.10.0
libtpu: 0.0.40
codegen_flags: <defaults>
</compile_context>

<pallas_src>
import jax
import jax.numpy as jnp
from jax.experimental import pallas as pl
from jax.experimental.pallas import tpu as pltpu


def _round_up(x: int, m: int) -> int:
    return ((x + m - 1) // m) * m


def supcon_loss(n_vec, a_vec, tau=0.9, *, block_k=256, block_m=512):
    """Pallas TPU implementation of SupConLoss.forward.

    n_vec: (K, D) normalized "normal" embeddings, a_vec: (M, D) "anomalous"
    embeddings.  Returns the scalar contrastive loss (float32).
    """
    assert n_vec.ndim == 2 and a_vec.ndim == 2
    assert n_vec.shape[1] == a_vec.shape[1]
    K, D = n_vec.shape
    M = a_vec.shape[0]

    # Hardware-friendly padding: lanes (128) on D, sublane/tile multiples on rows.
    d_pad = _round_up(D, 128)
    tile_k = min(block_k, _round_up(K, 8))
    tile_m = min(block_m, _round_up(M, 8))
    k_pad = _round_up(K, tile_k)
    m_pad = _round_up(M, tile_m)
    n_p = jnp.pad(n_vec, ((0, k_pad - K), (0, d_pad - D)))
    a_p = jnp.pad(a_vec, ((0, m_pad - M), (0, d_pad - D)))

    n_blocks_k = k_pad // tile_k
    n_blocks_m = m_pad // tile_m
    k_is_padded = k_pad != K
    m_is_padded = m_pad != M

    dims = (((1,), (1,)), ((), ()))  # contract the feature dim of LHS and RHS

    def kernel(tau_ref, n_blk_ref, n_all_ref, a_blk_ref, rowsum_ref, sum_a_ref):
        m = pl.program_id(1)

        inv_tau = 1.0 / tau_ref[0]                        # scalar f32 (one recip)
        n_blk = n_blk_ref[...]                            # (tile_k, d_pad), input dtype
        n_scaled = n_blk * inv_tau.astype(n_blk.dtype)    # fold 1/tau into LHS once

        @pl.when(m == 0)
        def _init():
            sum_a_ref[...] = jnp.zeros_like(sum_a_ref)

        # sum_a[i] += sum_j exp(<n_i, a_j>/tau) over this a-block (MXU + EUP).
        s_na = jax.lax.dot_general(n_scaled, a_blk_ref[...], dims,
                                   preferred_element_type=jnp.float32)
        e_na = jnp.exp(s_na)                              # (tile_k, tile_m) f32
        if m_is_padded:
            col = jax.lax.broadcasted_iota(jnp.int32, e_na.shape, 1) + m * tile_m
            e_na = jnp.where(col < M, e_na, 0.0)
        sum_a_ref[...] += jnp.sum(e_na, axis=1, keepdims=True)

        @pl.when(m == n_blocks_m - 1)
        def _finalize():
            sum_a = sum_a_ref[...]                        # (tile_k, 1) f32
            # Row block of n @ n.T (only the LHS carries 1/tau).
            s_nn = jax.lax.dot_general(n_scaled, n_all_ref[...], dims,
                                       preferred_element_type=jnp.float32)
            # log(e_nn/(e_nn + sum_a)) == -log(1 + sum_a * exp(-s_nn/tau))
            p = -jnp.log(1.0 + sum_a * jnp.exp(-s_nn))    # (tile_k, k_pad)
            if k_is_padded:
                col = jax.lax.broadcasted_iota(jnp.int32, p.shape, 1)
                p = jnp.where(col < K, p, 0.0)
            # Remove the diagonal contribution analytically: s_ii = <n_i/tau, n_i>.
            s_diag = jnp.sum(n_scaled.astype(jnp.float32) *
                             n_blk.astype(jnp.float32), axis=1, keepdims=True)
            p_diag = -jnp.log(1.0 + sum_a * jnp.exp(-s_diag))
            rowsum_ref[...] = jnp.sum(p, axis=1, keepdims=True) - p_diag

    tau_arr = jnp.asarray([tau], dtype=jnp.float32)

    row_sums = pl.pallas_call(
        kernel,
        out_shape=jax.ShapeDtypeStruct((k_pad, 1), jnp.float32),
        grid=(n_blocks_k, n_blocks_m),
        in_specs=[
            pl.BlockSpec(memory_space=pltpu.MemorySpace.SMEM),    # tau scalar
            pl.BlockSpec((tile_k, d_pad), lambda i, m: (i, 0)),   # n row block (LHS)
            pl.BlockSpec((k_pad, d_pad), lambda i, m: (0, 0)),    # full n (RHS, resident)
            pl.BlockSpec((tile_m, d_pad), lambda i, m: (m, 0)),   # a block (reduction)
        ],
        out_specs=pl.BlockSpec((tile_k, 1), lambda i, m: (i, 0)),
        scratch_shapes=[pltpu.VMEM((tile_k, 1), jnp.float32)],
        compiler_params=pltpu.CompilerParams(
            dimension_semantics=("parallel", "arbitrary"),
            vmem_limit_bytes=32 * 1024 * 1024,
        ),
    )(tau_arr, n_p, n_p, a_p)

    total = jnp.sum(row_sums[:K, 0])
    return -total / jnp.float32(K * (K - 1))


def _supcon_loss_ref(n_vec, a_vec, tau=0.9):
    """Pure-JAX reference mirroring the PyTorch code, for validation."""
    K = n_vec.shape[0]
    s_nn = n_vec @ n_vec.T
    mask = ~jnp.eye(K, dtype=bool)
    n_scores = jnp.exp(s_nn[mask].reshape(K, K - 1) / tau).reshape(-1, 1)
    n_a_scores = jnp.exp((n_vec @ a_vec.T) / tau)
    sum_n_a = jnp.sum(n_a_scores, axis=1, keepdims=True)
    sum_n_a = jnp.tile(sum_n_a, (1, K - 1)).reshape(-1, 1)
    p = jnp.log(n_scores / (n_scores + sum_n_a))
    return -jnp.sum(p) / (K * (K - 1))


if __name__ == "__main__":
    key = jax.random.PRNGKey(0)
    k1, k2 = jax.random.split(key)

    # Small shapes: K normal clips, M anomalous clips, D-dim embeddings.
    K, M, D = 8, 8, 32
    n_vec = jax.random.normal(k1, (K, D), dtype=jnp.float32)
    a_vec = jax.random.normal(k2, (M, D), dtype=jnp.float32)
    # The module expects normalized embedding vectors.
    n_vec = n_vec / jnp.linalg.norm(n_vec, axis=1, keepdims=True)
    a_vec = a_vec / jnp.linalg.norm(a_vec, axis=1, keepdims=True)

    # f32 path: tight check against the PyTorch-equivalent reference.
    loss = supcon_loss(n_vec, a_vec, tau=0.9)
    jax.block_until_ready(loss)
    ref = _supcon_loss_ref(n_vec, a_vec, tau=0.9)
    assert jnp.allclose(loss, ref, rtol=1e-4, atol=1e-4), (loss, ref)

    # bf16 embeddings: exercises the bf16 MXU path with f32 accumulation.
    n_bf = n_vec.astype(jnp.bfloat16)
    a_bf = a_vec.astype(jnp.bfloat16)
    loss_bf = supcon_loss(n_bf, a_bf, tau=0.9)
    jax.block_until_ready(loss_bf)
    ref_bf = _supcon_loss_ref(n_bf.astype(jnp.float32),
                              a_bf.astype(jnp.float32), tau=0.9)
    assert jnp.allclose(loss_bf, ref_bf, rtol=5e-2, atol=5e-2), (loss_bf, ref_bf)

    # Non-aligned shapes: exercises the padding + masking path.
    K2, M2, D2 = 10, 12, 48
    k3, k4 = jax.random.split(k2)
    n2 = jax.random.normal(k3, (K2, D2), dtype=jnp.float32)
    a2 = jax.random.normal(k4, (M2, D2), dtype=jnp.float32)
    n2 = n2 / jnp.linalg.norm(n2, axis=1, keepdims=True)
    a2 = a2 / jnp.linalg.norm(a2, axis=1, keepdims=True)
    loss2 = supcon_loss(n2, a2, tau=0.9)
    jax.block_until_ready(loss2)
    ref2 = _supcon_loss_ref(n2, a2, tau=0.9)
    assert jnp.allclose(loss2, ref2, rtol=1e-4, atol=1e-4), (loss2, ref2)

    print("KERNEL_OK")
</pallas_src>

<mosaic_0001>
module attributes {stable_mosaic.version = 11 : i64} {
  func.func @kernel(%arg0: i32, %arg1: i32, %arg2: memref<1xf32, #tpu.memory_space<smem>>, %arg3: memref<8x128xf32, #tpu.memory_space<vmem>>, %arg4: memref<8x128xf32, #tpu.memory_space<vmem>>, %arg5: memref<8x128xf32, #tpu.memory_space<vmem>>, %arg6: memref<8x1xf32, #tpu.memory_space<vmem>>, %arg7: memref<8x1xf32, #tpu.memory_space<vmem>>) attributes {dimension_semantics = [#tpu.dimension_semantics<parallel>, #tpu.dimension_semantics<arbitrary>], iteration_bounds = array<i64: 1, 1>, scalar_prefetch = 0 : i64, scratch_operands = 1 : i64, tpu.core_type = #tpu.core_type<tc>, window_params = [{transform_indices = @transform_0, window_bounds = array<i64: 1>}, {transform_indices = @transform_1, window_bounds = array<i64: 8, 128>}, {pipeline_mode = #tpu.pipeline_mode<synchronous>, transform_indices = @transform_2, window_bounds = array<i64: 8, 128>}, {transform_indices = @transform_3, window_bounds = array<i64: 8, 128>}, {transform_indices = @transform_4, window_bounds = array<i64: 8, 1>}]} {
    %c0 = arith.constant 0 : index
    %0 = memref.load %arg2[%c0] : memref<1xf32, #tpu.memory_space<smem>>
    %cst = arith.constant 1.000000e+00 : f32
    %1 = arith.divf %cst, %0 : f32
    %c0_0 = arith.constant 0 : index
    %c0_1 = arith.constant 0 : index
    %2 = vector.load %arg3[%c0_0, %c0_1] : memref<8x128xf32, #tpu.memory_space<vmem>>, vector<8x128xf32>
    %3 = vector.broadcast %1 : f32 to vector<8x128xf32>
    %4 = arith.mulf %2, %3 : vector<8x128xf32>
    %c0_i32 = arith.constant 0 : i32
    %5 = arith.cmpi eq, %arg1, %c0_i32 : i32
    %6 = arith.extui %5 : i1 to i32
    %c0_i32_2 = arith.constant 0 : i32
    %7 = arith.cmpi ne, %6, %c0_i32_2 : i32
    scf.if %7 {
      %cst_13 = arith.constant 0.000000e+00 : f32
      %19 = vector.broadcast %cst_13 : f32 to vector<8x1xf32>
      %c0_14 = arith.constant 0 : index
      %c0_15 = arith.constant 0 : index
      %20 = vector.load %arg7[%c0_14, %c0_15] : memref<8x1xf32, #tpu.memory_space<vmem>>, vector<8x1xf32>
      tpu.vector_store %arg7[%c0_14, %c0_15], %19 {strides = array<i32>} : memref<8x1xf32, #tpu.memory_space<vmem>>, vector<8x1xf32>,
    } else {
    }
    %c0_3 = arith.constant 0 : index
    %c0_4 = arith.constant 0 : index
    %8 = vector.load %arg5[%c0_3, %c0_4] : memref<8x128xf32, #tpu.memory_space<vmem>>, vector<8x128xf32>
    %cst_5 = arith.constant dense<0.000000e+00> : vector<8x8xf32>
    %9 = tpu.matmul %4, %8, %cst_5 {dimension_numbers = #tpu.dot_dimension_numbers<[1], [1], [0], [0], [0, 0, 1, 0], [], []>} : vector<8x128xf32>, vector<8x128xf32>, vector<8x8xf32> -> vector<8x8xf32>
    %10 = math.exp %9 : vector<8x8xf32>
    %c0_6 = arith.constant 0 : index
    %c0_7 = arith.constant 0 : index
    %11 = vector.load %arg7[%c0_6, %c0_7] : memref<8x1xf32, #tpu.memory_space<vmem>>, vector<8x1xf32>
    %cst_8 = arith.constant dense<0.000000e+00> : vector<8xf32>
    %12 = vector.multi_reduction <add>, %10, %cst_8 [1] : vector<8x8xf32> to vector<8xf32>
    %13 = vector.shape_cast %12 : vector<8xf32> to vector<8x1xf32>
    %14 = arith.addf %11, %13 : vector<8x1xf32>
    %c0_9 = arith.constant 0 : index
    %c0_10 = arith.constant 0 : index
    %15 = vector.load %arg7[%c0_9, %c0_10] : memref<8x1xf32, #tpu.memory_space<vmem>>, vector<8x1xf32>
    tpu.vector_store %arg7[%c0_9, %c0_10], %14 {strides = array<i32>} : memref<8x1xf32, #tpu.memory_space<vmem>>, vector<8x1xf32>,
    %c0_i32_11 = arith.constant 0 : i32
    %16 = arith.cmpi eq, %arg1, %c0_i32_11 : i32
    %17 = arith.extui %16 : i1 to i32
    %c0_i32_12 = arith.constant 0 : i32
    %18 = arith.cmpi ne, %17, %c0_i32_12 : i32
    scf.if %18 {
      %c0_13 = arith.constant 0 : index
      %c0_14 = arith.constant 0 : index
      %19 = vector.load %arg7[%c0_13, %c0_14] : memref<8x1xf32, #tpu.memory_space<vmem>>, vector<8x1xf32>
      %c0_15 = arith.constant 0 : index
      %c0_16 = arith.constant 0 : index
      %20 = vector.load %arg4[%c0_15, %c0_16] : memref<8x128xf32, #tpu.memory_space<vmem>>, vector<8x128xf32>
      %cst_17 = arith.constant dense<0.000000e+00> : vector<8x8xf32>
      %21 = tpu.matmul %4, %20, %cst_17 {dimension_numbers = #tpu.dot_dimension_numbers<[1], [1], [0], [0], [0, 0, 1, 0], [], []>} : vector<8x128xf32>, vector<8x128xf32>, vector<8x8xf32> -> vector<8x8xf32>
      %cst_18 = arith.constant 0.000000e+00 : f32
      %22 = vector.broadcast %cst_18 : f32 to vector<8x8xf32>
      %23 = arith.subf %22, %21 : vector<8x8xf32>
      %24 = math.exp %23 : vector<8x8xf32>
      %25 = vector.broadcast %19 : vector<8x1xf32> to vector<8x8xf32>
      %26 = arith.mulf %25, %24 : vector<8x8xf32>
      %cst_19 = arith.constant 1.000000e+00 : f32
      %27 = vector.broadcast %cst_19 : f32 to vector<8x8xf32>
      %28 = arith.addf %27, %26 : vector<8x8xf32>
      %29 = math.log %28 : vector<8x8xf32>
      %cst_20 = arith.constant 0.000000e+00 : f32
      %30 = vector.broadcast %cst_20 : f32 to vector<8x8xf32>
      %31 = arith.subf %30, %29 : vector<8x8xf32>
      %32 = arith.mulf %4, %2 : vector<8x128xf32>
      %cst_21 = arith.constant dense<0.000000e+00> : vector<8xf32>
      %33 = vector.multi_reduction <add>, %32, %cst_21 [1] : vector<8x128xf32> to vector<8xf32>
      %34 = vector.shape_cast %33 : vector<8xf32> to vector<8x1xf32>
      %cst_22 = arith.constant 0.000000e+00 : f32
      %35 = vector.broadcast %cst_22 : f32 to vector<8x1xf32>
      %36 = arith.subf %35, %34 : vector<8x1xf32>
      %37 = math.exp %36 : vector<8x1xf32>
      %38 = arith.mulf %19, %37 : vector<8x1xf32>
      %cst_23 = arith.constant 1.000000e+00 : f32
      %39 = vector.broadcast %cst_23 : f32 to vector<8x1xf32>
      %40 = arith.addf %39, %38 : vector<8x1xf32>
      %41 = math.log %40 : vector<8x1xf32>
      %cst_24 = arith.constant 0.000000e+00 : f32
      %42 = vector.broadcast %cst_24 : f32 to vector<8x1xf32>
      %43 = arith.subf %42, %41 : vector<8x1xf32>
      %cst_25 = arith.constant dense<0.000000e+00> : vector<8xf32>
      %44 = vector.multi_reduction <add>, %31, %cst_25 [1] : vector<8x8xf32> to vector<8xf32>
      %45 = vector.shape_cast %44 : vector<8xf32> to vector<8x1xf32>
      %46 = arith.subf %45, %43 : vector<8x1xf32>
      %c0_26 = arith.constant 0 : index
      %c0_27 = arith.constant 0 : index
      %47 = vector.load %arg6[%c0_26, %c0_27] : memref<8x1xf32, #tpu.memory_space<vmem>>, vector<8x1xf32>
      tpu.vector_store %arg6[%c0_26, %c0_27], %46 {strides = array<i32>} : memref<8x1xf32, #tpu.memory_space<vmem>>, vector<8x1xf32>,
    } else {
    }
    return
  }
  func.func @transform_0(%arg0: i32, %arg1: i32) -> i32 {
    %c0_i32 = arith.constant 0 : i32
    %c0_i32_0 = arith.constant 0 : i32
    return %c0_i32 : i32
  }
  func.func @transform_1(%arg0: i32, %arg1: i32) -> (i32, i32) {
    %c0_i32 = arith.constant 0 : i32
    %c0_i32_0 = arith.constant 0 : i32
    return %arg0, %c0_i32 : i32, i32
  }
  func.func @transform_2(%arg0: i32, %arg1: i32) -> (i32, i32) {
    %c0_i32 = arith.constant 0 : i32
    %c0_i32_0 = arith.constant 0 : i32
    %c0_i32_1 = arith.constant 0 : i32
    return %c0_i32, %c0_i32_0 : i32, i32
  }
  func.func @transform_3(%arg0: i32, %arg1: i32) -> (i32, i32) {
    %c0_i32 = arith.constant 0 : i32
    %c0_i32_0 = arith.constant 0 : i32
    return %arg1, %c0_i32 : i32, i32
  }
  func.func @transform_4(%arg0: i32, %arg1: i32) -> (i32, i32) {
    %c0_i32 = arith.constant 0 : i32
    %c0_i32_0 = arith.constant 0 : i32
    return %arg0, %c0_i32 : i32, i32
  }
}

</mosaic_0001>

<bundles_post_ra>
// kernel: tpu_custom_call.1
= control target key start
LH: loop header
LB: loop body
LE: loop exit
PB: predicated region body
PF: predicated region fallthrough
CT: control target
= control target key end

     0   :  { %10 = vsyncpa [#allocation5], 0  ;;  %s322_s0 = inlined_call_operand.<no memory space> [shape: f32[1], index: 0, kind: input, shape index: {}]   ;;  %s323_s1 = inlined_call_operand.hbm [shape: f32[8,128], index: 1, kind: input, shape index: {}]   ;;  %s324_s2 = inlined_call_operand.hbm [shape: f32[8,128], index: 2, kind: input, shape index: {}]   ;;  %s325_s3 = inlined_call_operand.hbm [shape: f32[8,128], index: 3, kind: input, shape index: {}]   ;;  %s326_s4 = inlined_call_operand.vmem [shape: f32[8,1], index: 4, kind: output, shape index: {}]  }
   0x1   :  { %11 = vsyncpa [#allocation7], 0  ;;  %s30_s17 = sshll.u32 %s324_s2, 4  ;;  %s272_s18 = smov [#allocation6]   ;;  %s31_s17 = int_to_ptr.hbm [resolvable:$true] %s30_s17 }
   0x2   :  { %s32_s19 = sshll.u32 %s272_s18, 4  ;;  %s19_s22 = sshll.u32 %s323_s1, 4  ;;  %s33_s19 = int_to_ptr.vmem [resolvable:$true] %s32_s19  ;;  %s20_s22 = int_to_ptr.hbm [resolvable:$true] %s19_s22 }
   0x3   :  { %35 = dma.hbm_to_vmem [thread:$0]  %s31_s17, 128, %s33_s19, [#allocation7]  }
   0x4   :  { %s273_s23 = smov [#allocation4]   ;;  %s41_s27 = sshll.u32 %s325_s3, 4  ;;  %s42_s27 = int_to_ptr.hbm [resolvable:$true] %s41_s27 }
   0x5   :  { %s21_s24 = sshll.u32 %s273_s23, 4  ;;  %s274_s2 = smov [#allocation8]   ;;  %s22_s24 = int_to_ptr.vmem [resolvable:$true] %s21_s24 }
   0x6   :  { %24 = dma.hbm_to_vmem [thread:$0]  %s20_s22, 128, %s22_s24, [#allocation5]  }
   0x7   :  { %s43_s28 = sshll.u32 %s274_s2, 4  ;;  %s44_s28 = int_to_ptr.vmem [resolvable:$true] %s43_s28 }
   0x8   :  { %46 = dma.hbm_to_vmem [thread:$0]  %s42_s27, 128, %s44_s28, [#allocation7]  }
   0x9   :  { %268 = dma.done.wait [#allocation5], 128  }
   0xa   :  { %269 = vsyncadd [#allocation5], 4294967168  ;;  %v60_v0 = vstv %s322_s0 }
   0xb   :  { %270 = dma.done.wait [#allocation7], 256  }
   0xc   :  { %271 = vsyncadd [#allocation7], 4294967040  ;;  %184 = vrcp.f32 %v60_v0  ;;  %v72_v3 = vand.u32 2147483648, %v60_v0  ;;  %vm66_vm0 = vweird.f32 %v60_v0  ;;  %v70_v5 = vand.u32 2147483647, %v60_v0  ;;  %v85_v11 = vld [vmem:[#allocation8] sm:$0xff] }
   0xd   :  { %v120_v12 = vld [vmem:[#allocation6] sm:$0xff]  ;;  %101 = vmatpush.xpose.msra.mxu0 %v85_v11  ;;  %v76_v13 = vld [vmem:[#allocation4] sm:$0xff]  ;;  %vm83_vm4 = vcmask 7168   ;;  %v275_v17 = vmov 0.0   ;;  %vm109_vm5 = vcmask 64512   ;;  %v276_v22 = vmov 0  }
   0xe   :  { %v73_v7 = vor.u32 1.1754944e-38, %v72_v3  ;;  %vm71_vm3 = vcmp.eq.f32.partialorder %v70_v5, 8.507059e+37  ;;  %136 = vmatpush.xpose.msra.mxu1 %v120_v12  ;;  %84 = vst.msk [vmem:[#allocation2] sm:$0xff] %vm83_vm4, %v275_v17  ;;  %183 = vset.pattern.permute.xlu0 %v276_v22 }
  0x12   :  { %v185_v1 = vpop.eup %184 }
  0x13   :  { %v62_v2 = vmul.f32 %v185_v1, %v60_v0  ;;  %vm67_vm1 = vweird.f32 %v185_v1 }
  0x14   :  { %vm68_vm2 = vmor %vm66_vm0, %vm67_vm1 }
  0x15   :  { %v63_v4 = vsub.f32 1.0, %v62_v2  ;;  %v108_v23 = vld [vmem:[#allocation2] sm:$0xff] }
  0x17   :  { %v64_v6 = vmul.f32 %v185_v1, %v63_v4 }
  0x19   :  { %v65_v8 = vadd.f32 %v185_v1, %v64_v6 }
  0x1b   :  { %v69_v9 = vsel %vm68_vm2, %v185_v1, %v65_v8 }
  0x1c   :  { %v74_v10 = vsel %vm71_vm3, %v73_v7, %v69_v9 }
  0x1d   :  { %176 = vpush %v74_v10 }
  0x4e   :  { %s177_s0 = spop %176 }
  0x4f   :  { %v77_v14 = vstv %s177_s0 }
  0x50   :  { %v78_v15 = vmul.f32 %v77_v14, %v76_v13 }
  0x52   :  { %102 = vmatmul.f32.vlgmr.msra.gmra.mxu0 %v78_v15  ;;  %137 = vmatmul.f32.vlgmr.msra.gmra.mxu1 %v78_v15  ;;  %v154_v16 = vmul.f32 %v78_v15, %v76_v13 }
  0x54   :  { %155 = vadd.xlane.f32.xlu1 %v154_v16 }
  0xc7   :  { %v156_v38 = vpop.xlane.xlu1 %155 }
  0xc8   :  { %v157_v39 = vsub.f32 0.0, %v156_v38 }
  0xca   :  { %v158_v40 = vmul.f32 1.442695, %v157_v39 }
  0xcf   :  { %v103_v18 = vpop.f32.mrf.mxu0  ;;  %v138_v27 = vpop.f32.mrf.mxu1 }
  0xd0   :  { %v106_v19 = vmul.f32 1.442695, %v103_v18  ;;  %v141_v28 = vsub.f32 0.0, %v138_v27 }
  0xd2   :  { %186 = vpow2.f32 %v106_v19  ;;  %v142_v29 = vmul.f32 1.442695, %v141_v28 }
  0xd4   :  { %188 = vpow2.f32 %v142_v29 }
  0xd8   :  { %v187_v20 = vpop.eup %186 }
  0xd9   :  { %v110_v21 = vsel %vm109_vm5, %v187_v20, 0.0 }
  0xda   :  { %111 = vadd.xlane.f32.xlu0 %v110_v21  ;;  %v189_v30 = vpop.eup %188 }
 0x14d   :  { %v112_v24 = vpop.xlane.xlu0 %111 }
 0x14e   :  { %v113_v25 = vadd.f32 %v112_v24, %v108_v23 }
 0x150   :  { %115 = vst.msk [vmem:[#allocation2] sm:$0xff] %vm83_vm4, %v113_v25 }
 0x157   :  { %v119_v26 = vld [vmem:[#allocation2] sm:$0xff] }
 0x158   :  { %146 = vperm.xlu0 %183, %v119_v26  }
 0x1ca   :  { %v147_v31 = vpop.permute.xlu0 %146 }
 0x1cb   :  { %v149_v32 = vmul.f32 %v189_v30, %v147_v31 }
 0x1cd   :  { %v150_v33 = vadd.f32 1.0, %v149_v32 }
 0x1cf   :  { %190 = vlog2.f32 %v150_v33 }
 0x1d0   :  { %192 = vpow2.f32 %v158_v40 }
 0x1d5   :  { %v191_v34 = vpop.eup %190 }
 0x1d6   :  { %v152_v35 = vmul.f32 0.6931472, %v191_v34  ;;  %v193_v41 = vpop.eup %192 }
 0x1d7   :  { %v160_v42 = vmul.f32 %v193_v41, %v119_v26 }
 0x1d8   :  { %v153_v36 = vsub.f32 0.0, %v152_v35 }
 0x1d9   :  { %v161_v43 = vadd.f32 1.0, %v160_v42 }
 0x1da   :  { %v165_v37 = vsel %vm109_vm5, %v153_v36, 0.0 }
 0x1db   :  { %166 = vadd.xlane.f32.xlu1 %v165_v37  ;;  %194 = vlog2.f32 %v161_v43 }
 0x1e1   :  { %v195_v44 = vpop.eup %194 }
 0x1e2   :  { %v163_v45 = vmul.f32 0.6931472, %v195_v44 }
 0x1e4   :  { %v164_v46 = vsub.f32 0.0, %v163_v45 }
 0x24e   :  { %v167_v47 = vpop.xlane.xlu1 %166 }
 0x24f   :  { %v168_v48 = vsub.f32 %v167_v47, %v164_v46 }
 0x251   :  { %169 = vst.msk [vmem:[%s326_s4] sm:$0xff] %vm83_vm4, %v168_v48 }
 0x252   :  { %174 = vsyncpa [#allocation5], 1 }
 0x253   :  { %175 = vsyncpa [#allocation7], 1 }

</bundles_post_ra>
